<compile_context>
chip_gen: v7x
topology: tpu7x:2x2x1
jax: 0.10.0
libtpu: 0.0.40
codegen_flags: <defaults>
</compile_context>

<pallas_src>
import jax
import jax.numpy as jnp
from jax.experimental import pallas as pl
from jax.experimental.pallas import tpu as pltpu


def _round_up(x, m):
    return ((x + m - 1) // m) * m


def _mlp_kernel(x_ref,
                w1_ref, b1_ref,
                w2_ref, b2_ref,
                w3_ref, b3_ref,
                w4_ref, b4_ref,
                w5_ref, b5_ref,
                o_ref):
    def dense(h, w_ref, b_ref):
        # bf16 MXU operands, f32 accumulation, f32 bias add.
        return jnp.dot(h.astype(w_ref.dtype), w_ref[...],
                       preferred_element_type=jnp.float32) + b_ref[...]

    h = dense(x_ref[...], w1_ref, b1_ref)          # Linear(in_pad, 128)
    h = jnp.tanh(h)                                # Tanh (f32, EUP)
    h = dense(h, w2_ref, b2_ref)                   # Linear(128, 256)
    h = jnp.maximum(h, 0.0)                        # ReLU
    h = dense(h, w3_ref, b3_ref)                   # Linear(256, 128)
    h = jnp.where(h > 0.0, h, 0.01 * h)            # LeakyReLU(0.01)
    h = dense(h, w4_ref, b4_ref)                   # Linear(128, 128 [64 + zero pad])
    h = jnp.maximum(h, 0.0)                        # ReLU (pad cols stay exactly 0)
    h = dense(h, w5_ref, b5_ref)                   # Linear(128, out_pad)
    o_ref[...] = h.astype(o_ref.dtype)


def feedforward_nn(obs, params, *, tile_b=256, use_bf16=True):
    """obs: (batch, in_dim) f32; params: list of (W, b) with W (in, out), b (1, out)."""
    obs = jnp.asarray(obs, jnp.float32)
    batch, in_dim = obs.shape
    out_dim = params[-1][0].shape[1]

    (w1, b1), (w2, b2), (w3, b3), (w4, b4), (w5, b5) = params

    # --- pad in_dim to a lane-dense multiple of 128 (zero cols / zero W1 rows) ---
    in_pad = _round_up(in_dim, 128)
    if in_pad != in_dim:
        obs = jnp.pad(obs, ((0, 0), (0, in_pad - in_dim)))
        w1 = jnp.pad(w1, ((0, in_pad - in_dim), (0, 0)))

    # --- pad the 64-wide hidden layer to 128 (exact: pad cols/bias/rows are 0) ---
    h4, h4_pad = w4.shape[1], 128
    if h4_pad != h4:
        w4 = jnp.pad(w4, ((0, 0), (0, h4_pad - h4)))
        b4 = jnp.pad(b4, ((0, 0), (0, h4_pad - h4)))
        w5 = jnp.pad(w5, ((0, h4_pad - h4), (0, 0)))

    # --- pad final layer to a lane-dense (multiple-of-128) output width --------
    out_pad = _round_up(out_dim, 128)
    if out_pad != out_dim:
        w5 = jnp.pad(w5, ((0, 0), (0, out_pad - out_dim)))
        b5 = jnp.pad(b5, ((0, 0), (0, out_pad - out_dim)))

    layer_params = [(w1, b1), (w2, b2), (w3, b3), (w4, b4), (w5, b5)]

    # --- batch tiling: TILE_B multiple of 8, batch padded to a tile multiple ---
    tile_b = max(8, min(int(tile_b), _round_up(batch, 8)))
    tile_b = _round_up(tile_b, 8)
    batch_pad = _round_up(batch, tile_b)
    if batch_pad != batch:
        obs = jnp.pad(obs, ((0, batch_pad - batch), (0, 0)))
    n_tiles = batch_pad // tile_b

    wdtype = jnp.bfloat16 if use_bf16 else jnp.float32

    flat_args = [obs]
    in_specs = [pl.BlockSpec((tile_b, in_pad), lambda i: (i, 0))]
    for w, b in layer_params:
        w = jnp.asarray(w, wdtype)          # bf16 MXU operands (halves weight DMA)
        b = jnp.asarray(b, jnp.float32)     # bias stays f32
        flat_args.extend([w, b])
        # Constant index_maps: weights/biases DMA'd once, resident across the grid.
        in_specs.append(pl.BlockSpec(w.shape, lambda i: (0, 0)))
        in_specs.append(pl.BlockSpec(b.shape, lambda i: (0, 0)))

    out_spec = pl.BlockSpec((tile_b, out_pad), lambda i: (i, 0))

    out = pl.pallas_call(
        _mlp_kernel,
        out_shape=jax.ShapeDtypeStruct((batch_pad, out_pad), jnp.float32),
        grid=(n_tiles,),
        in_specs=in_specs,
        out_specs=out_spec,
        compiler_params=pltpu.CompilerParams(
            dimension_semantics=("parallel",),
        ),
    )(*flat_args)

    return out[:batch, :out_dim]


def init_params(key, in_dim, out_dim):
    """Deterministic synthetic init matching the PyTorch layer shapes."""
    dims = [(in_dim, 128), (128, 256), (256, 128), (128, 64), (64, out_dim)]
    params = []
    for fan_in, fan_out in dims:
        key, kw, kb = jax.random.split(key, 3)
        bound = 1.0 / jnp.sqrt(fan_in)
        w = jax.random.uniform(kw, (fan_in, fan_out), jnp.float32, -bound, bound)
        b = jax.random.uniform(kb, (1, fan_out), jnp.float32, -bound, bound)
        params.append((w, b))
    return params


def reference_forward(obs, params, *, wdtype=jnp.float32):
    """Pure-JAX reference. wdtype=bf16 matches the kernel's MXU operand casting."""
    acts = [jnp.tanh,
            lambda z: jnp.maximum(z, 0.0),
            lambda z: jnp.where(z > 0.0, z, 0.01 * z),
            lambda z: jnp.maximum(z, 0.0),
            lambda z: z]
    h = obs
    for (w, b), act in zip(params, acts):
        y = jnp.dot(h.astype(wdtype), w.astype(wdtype),
                    preferred_element_type=jnp.float32) + b
        h = act(y)
    return h


if __name__ == "__main__":
    key = jax.random.PRNGKey(0)
    batch, in_dim, out_dim = 8, 16, 8

    key, kobs = jax.random.split(key)
    obs = jax.random.normal(kobs, (batch, in_dim), jnp.float32)
    params = init_params(key, in_dim, out_dim)

    out = feedforward_nn(obs, params)
    out = jax.block_until_ready(out)
    assert out.shape == (batch, out_dim)

    # Tight check against a reference that uses the same bf16-operand /
    # f32-accumulate math as the kernel.
    ref_bf16 = reference_forward(obs, params, wdtype=jnp.bfloat16)
    assert jnp.allclose(out, ref_bf16, atol=1e-4, rtol=1e-4), \
        "mismatch vs bf16-matched reference"

    # Sanity check against the full-f32 PyTorch-equivalent forward.
    ref_f32 = reference_forward(obs, params, wdtype=jnp.float32)
    assert jnp.allclose(out, ref_f32, atol=3e-2, rtol=3e-2), \
        "mismatch vs f32 reference"

    print("KERNEL_OK")
</pallas_src>

<mosaic_0001>
module attributes {stable_mosaic.version = 11 : i64} {
  func.func @_mlp_kernel(%arg0: i32, %arg1: memref<8x128xf32, #tpu.memory_space<vmem>>, %arg2: memref<128x128xbf16, #tpu.memory_space<vmem>>, %arg3: memref<1x128xf32, #tpu.memory_space<vmem>>, %arg4: memref<128x256xbf16, #tpu.memory_space<vmem>>, %arg5: memref<1x256xf32, #tpu.memory_space<vmem>>, %arg6: memref<256x128xbf16, #tpu.memory_space<vmem>>, %arg7: memref<1x128xf32, #tpu.memory_space<vmem>>, %arg8: memref<128x128xbf16, #tpu.memory_space<vmem>>, %arg9: memref<1x128xf32, #tpu.memory_space<vmem>>, %arg10: memref<128x128xbf16, #tpu.memory_space<vmem>>, %arg11: memref<1x128xf32, #tpu.memory_space<vmem>>, %arg12: memref<8x128xf32, #tpu.memory_space<vmem>>) attributes {dimension_semantics = [#tpu.dimension_semantics<parallel>], iteration_bounds = array<i64: 1>, scalar_prefetch = 0 : i64, scratch_operands = 0 : i64, tpu.core_type = #tpu.core_type<tc>, window_params = [{transform_indices = @transform_0, window_bounds = array<i64: 8, 128>}, {pipeline_mode = #tpu.pipeline_mode<synchronous>, transform_indices = @transform_1, window_bounds = array<i64: 128, 128>}, {pipeline_mode = #tpu.pipeline_mode<synchronous>, transform_indices = @transform_2, window_bounds = array<i64: 1, 128>}, {pipeline_mode = #tpu.pipeline_mode<synchronous>, transform_indices = @transform_3, window_bounds = array<i64: 128, 256>}, {pipeline_mode = #tpu.pipeline_mode<synchronous>, transform_indices = @transform_4, window_bounds = array<i64: 1, 256>}, {pipeline_mode = #tpu.pipeline_mode<synchronous>, transform_indices = @transform_5, window_bounds = array<i64: 256, 128>}, {pipeline_mode = #tpu.pipeline_mode<synchronous>, transform_indices = @transform_6, window_bounds = array<i64: 1, 128>}, {pipeline_mode = #tpu.pipeline_mode<synchronous>, transform_indices = @transform_7, window_bounds = array<i64: 128, 128>}, {pipeline_mode = #tpu.pipeline_mode<synchronous>, transform_indices = @transform_8, window_bounds = array<i64: 1, 128>}, {pipeline_mode = #tpu.pipeline_mode<synchronous>, transform_indices = @transform_9, window_bounds = array<i64: 128, 128>}, {pipeline_mode = #tpu.pipeline_mode<synchronous>, transform_indices = @transform_10, window_bounds = array<i64: 1, 128>}, {transform_indices = @transform_11, window_bounds = array<i64: 8, 128>}]} {
    %c0 = arith.constant 0 : index
    %c0_0 = arith.constant 0 : index
    %0 = vector.load %arg1[%c0, %c0_0] : memref<8x128xf32, #tpu.memory_space<vmem>>, vector<8x128xf32>
    %1 = arith.truncf %0 : vector<8x128xf32> to vector<8x128xbf16>
    %c0_1 = arith.constant 0 : index
    %c0_2 = arith.constant 0 : index
    %2 = vector.load %arg2[%c0_1, %c0_2] : memref<128x128xbf16, #tpu.memory_space<vmem>>, vector<128x128xbf16>
    %cst = arith.constant dense<0.000000e+00> : vector<8x128xf32>
    %3 = tpu.matmul %1, %2, %cst {dimension_numbers = #tpu.dot_dimension_numbers<[1], [0], [0], [1], [0, 0, 1, 1], [], []>} : vector<8x128xbf16>, vector<128x128xbf16>, vector<8x128xf32> -> vector<8x128xf32>
    %c0_3 = arith.constant 0 : index
    %c0_4 = arith.constant 0 : index
    %4 = vector.load %arg3[%c0_3, %c0_4] : memref<1x128xf32, #tpu.memory_space<vmem>>, vector<1x128xf32>
    %5 = vector.broadcast %4 : vector<1x128xf32> to vector<8x128xf32>
    %6 = arith.addf %3, %5 : vector<8x128xf32>
    %7 = math.tanh %6 : vector<8x128xf32>
    %8 = arith.truncf %7 : vector<8x128xf32> to vector<8x128xbf16>
    %c0_5 = arith.constant 0 : index
    %c0_6 = arith.constant 0 : index
    %9 = vector.load %arg4[%c0_5, %c0_6] : memref<128x256xbf16, #tpu.memory_space<vmem>>, vector<128x256xbf16>
    %cst_7 = arith.constant dense<0.000000e+00> : vector<8x256xf32>
    %10 = tpu.matmul %8, %9, %cst_7 {dimension_numbers = #tpu.dot_dimension_numbers<[1], [0], [0], [1], [0, 0, 1, 1], [], []>} : vector<8x128xbf16>, vector<128x256xbf16>, vector<8x256xf32> -> vector<8x256xf32>
    %c0_8 = arith.constant 0 : index
    %c0_9 = arith.constant 0 : index
    %11 = vector.load %arg5[%c0_8, %c0_9] : memref<1x256xf32, #tpu.memory_space<vmem>>, vector<1x256xf32>
    %12 = vector.broadcast %11 : vector<1x256xf32> to vector<8x256xf32>
    %13 = arith.addf %10, %12 : vector<8x256xf32>
    %cst_10 = arith.constant 0.000000e+00 : f32
    %14 = vector.broadcast %cst_10 : f32 to vector<8x256xf32>
    %15 = arith.maximumf %13, %14 : vector<8x256xf32>
    %16 = arith.truncf %15 : vector<8x256xf32> to vector<8x256xbf16>
    %c0_11 = arith.constant 0 : index
    %c0_12 = arith.constant 0 : index
    %17 = vector.load %arg6[%c0_11, %c0_12] : memref<256x128xbf16, #tpu.memory_space<vmem>>, vector<256x128xbf16>
    %cst_13 = arith.constant dense<0.000000e+00> : vector<8x128xf32>
    %18 = tpu.matmul %16, %17, %cst_13 {dimension_numbers = #tpu.dot_dimension_numbers<[1], [0], [0], [1], [0, 0, 1, 1], [], []>} : vector<8x256xbf16>, vector<256x128xbf16>, vector<8x128xf32> -> vector<8x128xf32>
    %c0_14 = arith.constant 0 : index
    %c0_15 = arith.constant 0 : index
    %19 = vector.load %arg7[%c0_14, %c0_15] : memref<1x128xf32, #tpu.memory_space<vmem>>, vector<1x128xf32>
    %20 = vector.broadcast %19 : vector<1x128xf32> to vector<8x128xf32>
    %21 = arith.addf %18, %20 : vector<8x128xf32>
    %cst_16 = arith.constant 0.000000e+00 : f32
    %22 = vector.broadcast %cst_16 : f32 to vector<8x128xf32>
    %23 = arith.cmpf ogt, %21, %22 : vector<8x128xf32>
    %cst_17 = arith.constant 0.00999999977 : f32
    %24 = vector.broadcast %cst_17 : f32 to vector<8x128xf32>
    %25 = arith.mulf %24, %21 : vector<8x128xf32>
    %26 = arith.select %23, %21, %25 : vector<8x128xi1>, vector<8x128xf32>
    %27 = arith.truncf %26 : vector<8x128xf32> to vector<8x128xbf16>
    %c0_18 = arith.constant 0 : index
    %c0_19 = arith.constant 0 : index
    %28 = vector.load %arg8[%c0_18, %c0_19] : memref<128x128xbf16, #tpu.memory_space<vmem>>, vector<128x128xbf16>
    %cst_20 = arith.constant dense<0.000000e+00> : vector<8x128xf32>
    %29 = tpu.matmul %27, %28, %cst_20 {dimension_numbers = #tpu.dot_dimension_numbers<[1], [0], [0], [1], [0, 0, 1, 1], [], []>} : vector<8x128xbf16>, vector<128x128xbf16>, vector<8x128xf32> -> vector<8x128xf32>
    %c0_21 = arith.constant 0 : index
    %c0_22 = arith.constant 0 : index
    %30 = vector.load %arg9[%c0_21, %c0_22] : memref<1x128xf32, #tpu.memory_space<vmem>>, vector<1x128xf32>
    %31 = vector.broadcast %30 : vector<1x128xf32> to vector<8x128xf32>
    %32 = arith.addf %29, %31 : vector<8x128xf32>
    %cst_23 = arith.constant 0.000000e+00 : f32
    %33 = vector.broadcast %cst_23 : f32 to vector<8x128xf32>
    %34 = arith.maximumf %32, %33 : vector<8x128xf32>
    %35 = arith.truncf %34 : vector<8x128xf32> to vector<8x128xbf16>
    %c0_24 = arith.constant 0 : index
    %c0_25 = arith.constant 0 : index
    %36 = vector.load %arg10[%c0_24, %c0_25] : memref<128x128xbf16, #tpu.memory_space<vmem>>, vector<128x128xbf16>
    %cst_26 = arith.constant dense<0.000000e+00> : vector<8x128xf32>
    %37 = tpu.matmul %35, %36, %cst_26 {dimension_numbers = #tpu.dot_dimension_numbers<[1], [0], [0], [1], [0, 0, 1, 1], [], []>} : vector<8x128xbf16>, vector<128x128xbf16>, vector<8x128xf32> -> vector<8x128xf32>
    %c0_27 = arith.constant 0 : index
    %c0_28 = arith.constant 0 : index
    %38 = vector.load %arg11[%c0_27, %c0_28] : memref<1x128xf32, #tpu.memory_space<vmem>>, vector<1x128xf32>
    %39 = vector.broadcast %38 : vector<1x128xf32> to vector<8x128xf32>
    %40 = arith.addf %37, %39 : vector<8x128xf32>
    %c0_29 = arith.constant 0 : index
    %c0_30 = arith.constant 0 : index
    %41 = vector.load %arg12[%c0_29, %c0_30] : memref<8x128xf32, #tpu.memory_space<vmem>>, vector<8x128xf32>
    tpu.vector_store %arg12[%c0_29, %c0_30], %40 {strides = array<i32>} : memref<8x128xf32, #tpu.memory_space<vmem>>, vector<8x128xf32>,
    return
  }
  func.func @transform_0(%arg0: i32) -> (i32, i32) {
    %c0_i32 = arith.constant 0 : i32
    %c0_i32_0 = arith.constant 0 : i32
    return %arg0, %c0_i32 : i32, i32
  }
  func.func @transform_1(%arg0: i32) -> (i32, i32) {
    %c0_i32 = arith.constant 0 : i32
    %c0_i32_0 = arith.constant 0 : i32
    %c0_i32_1 = arith.constant 0 : i32
    return %c0_i32, %c0_i32_0 : i32, i32
  }
  func.func @transform_2(%arg0: i32) -> (i32, i32) {
    %c0_i32 = arith.constant 0 : i32
    %c0_i32_0 = arith.constant 0 : i32
    %c0_i32_1 = arith.constant 0 : i32
    return %c0_i32, %c0_i32_0 : i32, i32
  }
  func.func @transform_3(%arg0: i32) -> (i32, i32) {
    %c0_i32 = arith.constant 0 : i32
    %c0_i32_0 = arith.constant 0 : i32
    %c0_i32_1 = arith.constant 0 : i32
    return %c0_i32, %c0_i32_0 : i32, i32
  }
  func.func @transform_4(%arg0: i32) -> (i32, i32) {
    %c0_i32 = arith.constant 0 : i32
    %c0_i32_0 = arith.constant 0 : i32
    %c0_i32_1 = arith.constant 0 : i32
    return %c0_i32, %c0_i32_0 : i32, i32
  }
  func.func @transform_5(%arg0: i32) -> (i32, i32) {
    %c0_i32 = arith.constant 0 : i32
    %c0_i32_0 = arith.constant 0 : i32
    %c0_i32_1 = arith.constant 0 : i32
    return %c0_i32, %c0_i32_0 : i32, i32
  }
  func.func @transform_6(%arg0: i32) -> (i32, i32) {
    %c0_i32 = arith.constant 0 : i32
    %c0_i32_0 = arith.constant 0 : i32
    %c0_i32_1 = arith.constant 0 : i32
    return %c0_i32, %c0_i32_0 : i32, i32
  }
  func.func @transform_7(%arg0: i32) -> (i32, i32) {
    %c0_i32 = arith.constant 0 : i32
    %c0_i32_0 = arith.constant 0 : i32
    %c0_i32_1 = arith.constant 0 : i32
    return %c0_i32, %c0_i32_0 : i32, i32
  }
  func.func @transform_8(%arg0: i32) -> (i32, i32) {
    %c0_i32 = arith.constant 0 : i32
    %c0_i32_0 = arith.constant 0 : i32
    %c0_i32_1 = arith.constant 0 : i32
    return %c0_i32, %c0_i32_0 : i32, i32
  }
  func.func @transform_9(%arg0: i32) -> (i32, i32) {
    %c0_i32 = arith.constant 0 : i32
    %c0_i32_0 = arith.constant 0 : i32
    %c0_i32_1 = arith.constant 0 : i32
    return %c0_i32, %c0_i32_0 : i32, i32
  }
  func.func @transform_10(%arg0: i32) -> (i32, i32) {
    %c0_i32 = arith.constant 0 : i32
    %c0_i32_0 = arith.constant 0 : i32
    %c0_i32_1 = arith.constant 0 : i32
    return %c0_i32, %c0_i32_0 : i32, i32
  }
  func.func @transform_11(%arg0: i32) -> (i32, i32) {
    %c0_i32 = arith.constant 0 : i32
    %c0_i32_0 = arith.constant 0 : i32
    return %arg0, %c0_i32 : i32, i32
  }
}

</mosaic_0001>

<bundles_post_ra>
// kernel: tpu_custom_call.1
= control target key start
LH: loop header
LB: loop body
LE: loop exit
PB: predicated region body
PF: predicated region fallthrough
CT: control target
= control target key end

     0   :  { %16 = vsyncpa [#allocation3], 0  ;;  %s1445_s0 = inlined_call_operand.hbm [shape: f32[8,128], index: 0, kind: input, shape index: {}]   ;;  %s1446_s1 = inlined_call_operand.hbm [shape: bf16[128,128], index: 1, kind: input, shape index: {}]   ;;  %s1447_s2 = inlined_call_operand.vmem [shape: f32[1,128], index: 2, kind: input, shape index: {}]   ;;  %s1448_s3 = inlined_call_operand.hbm [shape: bf16[128,256], index: 3, kind: input, shape index: {}]   ;;  %s1449_s4 = inlined_call_operand.vmem [shape: f32[1,256], index: 4, kind: input, shape index: {}]   ;;  %s1450_s5 = inlined_call_operand.hbm [shape: bf16[256,128], index: 5, kind: input, shape index: {}]   ;;  %s1451_s6 = inlined_call_operand.vmem [shape: f32[1,128], index: 6, kind: input, shape index: {}]   ;;  %s1452_s7 = inlined_call_operand.hbm [shape: bf16[128,128], index: 7, kind: input, shape index: {}]   ;;  %s1453_s8 = inlined_call_operand.vmem [shape: f32[1,128], index: 8, kind: input, shape index: {}]   ;;  %s1454_s9 = inlined_call_operand.hbm [shape: bf16[128,128], index: 9, kind: input, shape index: {}]   ;;  %s1455_s10 = inlined_call_operand.vmem [shape: f32[1,128], index: 10, kind: input, shape index: {}]   ;;  %s1456_s11 = inlined_call_operand.hbm [shape: f32[8,128], index: 11, kind: output, shape index: {}]  }
   0x1   :  { %17 = vsyncpa [#allocation6], 0 }
   0x2   :  { %18 = vsyncpa [#allocation9], 0 }
   0x3   :  { %19 = vsyncpa [#allocation12], 0 }
   0x4   :  { %20 = vsyncpa [#allocation4], 0  ;;  %s1223_s17 = smov [#allocation5]   ;;  %s1059_s21 = scalar_lea.hbm %s1446_s1, 1024 }
   0x5   :  { %s36_s18 = sshll.u32 %s1223_s17, 4  ;;  %p1060_p0 = scmp.ne.s32.totalorder %s1446_s1, %s1059_s21  ;;  %s37_s18 = int_to_ptr.vmem [resolvable:$true] %s36_s18 }
   0x6   :  { %p1063_p1 = scmp.lt.u32.totalorder %s1059_s21, %s1446_s1 }
   0x8   :  { %p1065_p2 = pnand %p1063_p1, %p1060_p0 }
   0xa   :  { %1068 = shalt.err (!%p1065_p2)
}
   0xb   :  { %s1069_s26 = scalar_lea.vmem %s37_s18, 1024  ;;  %p1074_p4 = scmp.lt.s32.totalorder %s37_s18, %s37_s18 }
   0xc   :  { %p1070_p3 = scmp.ne.s32.totalorder %s37_s18, %s1069_s26  ;;  %p1075_p5 = scmp.lt.s32.totalorder %s1069_s26, %s1069_s26 }
   0xe   :  { %p1076_p6 = por %p1075_p5, %p1074_p4 }
  0x10   :  { %p1077_p7 = pnand %p1076_p6, %p1070_p3 }
  0x12   :  { %1080 = shalt.err (!%p1077_p7)
}
  0x13   :  { %s1224_s27 = smov 64   ;;  %s1225_s28 = smov 4  }
  0x14   :  { %42 = dma.hbm_to_vmem [thread:$0]  %s1446_s1, 1024, %s37_s18, [#allocation6], %s1224_s27, %s1224_s27, %s1225_s28  }
  0x15   :  { %s1226_s12 = smov [#allocation8]   ;;  %s1227_s14 = smov [#allocation2]  }
  0x16   :  { %s64_s13 = sshll.u32 %s1226_s12, 4  ;;  %s27_s15 = sshll.u32 %s1227_s14, 4  ;;  %s65_s13 = int_to_ptr.vmem [resolvable:$true] %s64_s13  ;;  %s28_s15 = int_to_ptr.vmem [resolvable:$true] %s27_s15 }
  0x17   :  { %s1081_s19 = scalar_lea.hbm %s1450_s5, 2048 }
  0x18   :  { %p1082_p8 = scmp.ne.s32.totalorder %s1450_s5, %s1081_s19  ;;  %p1085_p9 = scmp.lt.u32.totalorder %s1081_s19, %s1450_s5 }
  0x1a   :  { %p1087_p10 = pnand %p1085_p9, %p1082_p8 }
  0x1c   :  { %1090 = shalt.err (!%p1087_p10)
}
  0x1d   :  { %s1091_s1 = scalar_lea.vmem %s65_s13, 2048  ;;  %p1096_p12 = scmp.lt.s32.totalorder %s65_s13, %s65_s13 }
  0x1e   :  { %p1092_p11 = scmp.ne.s32.totalorder %s65_s13, %s1091_s1  ;;  %p1097_p13 = scmp.lt.s32.totalorder %s1091_s1, %s1091_s1 }
  0x20   :  { %p1098_p0 = por %p1097_p13, %p1096_p12 }
  0x22   :  { %p1099_p1 = pnand %p1098_p0, %p1092_p11 }
  0x24   :  { %1102 = shalt.err (!%p1099_p1)
}
  0x25   :  { %70 = dma.hbm_to_vmem [thread:$0]  %s1450_s5, 2048, %s65_s13, [#allocation9], %s1224_s27, %s1224_s27, %s1225_s28  }
  0x26   :  { %s1103_s29 = scalar_lea.hbm %s1445_s0, 128 }
  0x27   :  { %p1104_p2 = scmp.ne.s32.totalorder %s1445_s0, %s1103_s29  ;;  %p1107_p3 = scmp.lt.u32.totalorder %s1103_s29, %s1445_s0 }
  0x29   :  { %p1109_p4 = pnand %p1107_p3, %p1104_p2 }
  0x2b   :  { %1112 = shalt.err (!%p1109_p4)
}
  0x2c   :  { %s1113_s17 = scalar_lea.vmem %s28_s15, 128  ;;  %p1118_p6 = scmp.lt.s32.totalorder %s28_s15, %s28_s15 }
  0x2d   :  { %p1114_p5 = scmp.ne.s32.totalorder %s28_s15, %s1113_s17  ;;  %p1119_p7 = scmp.lt.s32.totalorder %s1113_s17, %s1113_s17 }
  0x2f   :  { %p1120_p8 = por %p1119_p7, %p1118_p6 }
  0x31   :  { %p1121_p9 = pnand %p1120_p8, %p1114_p5 }
  0x33   :  { %1124 = shalt.err (!%p1121_p9)
}
  0x34   :  { %30 = dma.hbm_to_vmem [thread:$0]  %s1445_s0, 128, %s28_s15, [#allocation3]  }
  0x35   :  { %s1228_s19 = smov [#allocation7]   ;;  %s1125_s23 = scalar_lea.hbm %s1448_s3, 2048 }
  0x36   :  { %s50_s20 = sshll.u32 %s1228_s19, 4  ;;  %p1126_p10 = scmp.ne.s32.totalorder %s1448_s3, %s1125_s23  ;;  %s51_s20 = int_to_ptr.vmem [resolvable:$true] %s50_s20 }
  0x37   :  { %p1129_p11 = scmp.lt.u32.totalorder %s1125_s23, %s1448_s3 }
  0x39   :  { %p1131_p12 = pnand %p1129_p11, %p1126_p10 }
  0x3b   :  { %1134 = shalt.err (!%p1131_p12)
}
  0x3c   :  { %s1135_s26 = scalar_lea.vmem %s51_s20, 2048  ;;  %p1140_p0 = scmp.lt.s32.totalorder %s51_s20, %s51_s20 }
  0x3d   :  { %p1136_p13 = scmp.ne.s32.totalorder %s51_s20, %s1135_s26  ;;  %p1141_p1 = scmp.lt.s32.totalorder %s1135_s26, %s1135_s26 }
  0x3f   :  { %p1142_p2 = por %p1141_p1, %p1140_p0 }
  0x41   :  { %p1143_p3 = pnand %p1142_p2, %p1136_p13 }
  0x43   :  { %1146 = shalt.err (!%p1143_p3)
}
  0x44   :  { %s1229_s0 = smov 128   ;;  %s1230_s15 = smov 8  }
  0x45   :  { %56 = dma.hbm_to_vmem [thread:$0]  %s1448_s3, 2048, %s51_s20, [#allocation6], %s1229_s0, %s1229_s0, %s1230_s15  }
  0x46   :  { %s1231_s12 = smov [#allocation10]   ;;  %s1232_s16 = smov [#allocation11]  }
  0x47   :  { %s78_s14 = sshll.u32 %s1231_s12, 4  ;;  %s92_s17 = sshll.u32 %s1232_s16, 4  ;;  %s79_s14 = int_to_ptr.vmem [resolvable:$true] %s78_s14  ;;  %s1351_s17 = int_to_ptr.vmem [resolvable:$true] %s92_s17 }
  0x48   :  { %s1147_s19 = scalar_lea.hbm %s1452_s7, 1024 }
  0x49   :  { %p1148_p4 = scmp.ne.s32.totalorder %s1452_s7, %s1147_s19  ;;  %p1151_p5 = scmp.lt.u32.totalorder %s1147_s19, %s1452_s7 }
  0x4b   :  { %p1153_p6 = pnand %p1151_p5, %p1148_p4 }
  0x4d   :  { %1156 = shalt.err (!%p1153_p6)
}
  0x4e   :  { %s1157_s3 = scalar_lea.vmem %s79_s14, 1024  ;;  %p1162_p8 = scmp.lt.s32.totalorder %s79_s14, %s79_s14 }
  0x4f   :  { %p1158_p7 = scmp.ne.s32.totalorder %s79_s14, %s1157_s3  ;;  %p1163_p9 = scmp.lt.s32.totalorder %s1157_s3, %s1157_s3 }
  0x51   :  { %p1164_p10 = por %p1163_p9, %p1162_p8 }
  0x53   :  { %p1165_p11 = pnand %p1164_p10, %p1158_p7 }
  0x55   :  { %1168 = shalt.err (!%p1165_p11)
}
  0x56   :  { %84 = dma.hbm_to_vmem [thread:$0]  %s1452_s7, 1024, %s79_s14, [#allocation9], %s1224_s27, %s1224_s27, %s1225_s28  }
  0x57   :  { %s1169_s26 = scalar_lea.hbm %s1454_s9, 1024 }
  0x58   :  { %p1170_p12 = scmp.ne.s32.totalorder %s1454_s9, %s1169_s26  ;;  %p1173_p13 = scmp.lt.u32.totalorder %s1169_s26, %s1454_s9 }
  0x5a   :  { %p1175_p0 = pnand %p1173_p13, %p1170_p12 }
  0x5c   :  { %1178 = shalt.err (!%p1175_p0)
}
  0x5d   :  { %s1179_s12 = scalar_lea.vmem %s1351_s17, 1024  ;;  %p1184_p2 = scmp.lt.s32.totalorder %s1351_s17, %s1351_s17 }
  0x5e   :  { %p1180_p1 = scmp.ne.s32.totalorder %s1351_s17, %s1179_s12  ;;  %p1185_p3 = scmp.lt.s32.totalorder %s1179_s12, %s1179_s12 }
  0x60   :  { %p1186_p4 = por %p1185_p3, %p1184_p2 }
  0x62   :  { %p1187_p5 = pnand %p1186_p4, %p1180_p1 }
  0x64   :  { %1190 = shalt.err (!%p1187_p5)
}
  0x65   :  { %98 = dma.hbm_to_vmem [thread:$0]  %s1454_s9, 1024, %s1351_s17, [#allocation12], %s1224_s27, %s1224_s27, %s1225_s28  }
  0x66   :  { %1213 = dma.done.wait [#allocation3], 128  }
  0x67   :  { %1214 = vsyncadd [#allocation3], 4294967168 }
  0x68   :  { %1215 = dma.done.wait [#allocation6], 3072  }
  0x69   :  { %1216 = vsyncadd [#allocation6], 4294964224 }
  0x6a   :  { %1217 = dma.done.wait [#allocation9], 3072  }
  0x6b   :  { %1218 = vsyncadd [#allocation9], 4294964224 }
  0x6c   :  { %1219 = dma.done.wait [#allocation12], 1024  }
  0x6d   :  { %1220 = vsyncadd [#allocation12], 4294966272  ;;  %v1233_v0 = vmov 0.0   ;;  %vm1234_vm0 = vmmov 0   ;;  %v993_v1 = vld [vmem:[#allocation5] sm:$0xff]   ;;  %v994_v2 = vld [vmem:[#allocation5 + $0x8] sm:$0xff]   ;;  %v253_v57 = vlaneseq }
  0x6e   :  { %919 = vmatprep.subr.bf16.mxu0 %v1233_v0  ;;  %935 = vmatprep.mubr.msk.bf16.mxu0 %vm1234_vm0, %v1233_v0  ;;  %v995_v3 = vld [vmem:[#allocation5 + $0x10] sm:$0xff]   ;;  %v1001_v4 = vld [vmem:[#allocation7 + $0x4] ss:$8 sps:$4 sm:$0xff]   ;;  %v1003_v5 = vld [vmem:[#allocation7] ss:$8 sps:$4 sm:$0xff]   ;;  %v1235_v27 = vmov 0  }
  0x6f   :  { %920 = vmatpush3.bf16.msra.mxu0 %v993_v1  ;;  %v996_v6 = vld [vmem:[#allocation5 + $0x18] sm:$0xff]   ;;  %343 = vmatprep.subr.bf16.mxu1 %v1001_v4  ;;  %v997_v9 = vld [vmem:[#allocation5 + $0x20] sm:$0xff]   ;;  %v998_v13 = vld [vmem:[#allocation5 + $0x28] sm:$0xff]   ;;  %v254_v58 = vshrl.u32 %v253_v57, 7  ;;  %s1236_s19 = smov [#allocation13]  }
  0x70   :  { %921 = vmatprep.subr.bf16.mxu0 %v1233_v0  ;;  %v1004_v7 = vld [vmem:[#allocation7 + $0x14] ss:$8 sps:$4 sm:$0xff]   ;;  %344 = vmatpush1.bf16.msra.mxu1 %v1003_v5  ;;  %v1006_v8 = vld [vmem:[#allocation7 + $0x10] ss:$8 sps:$4 sm:$0xff]   ;;  %v1007_v10 = vld [vmem:[#allocation7 + $0x24] ss:$8 sps:$4 sm:$0xff]  }
  0x71   :  { %345 = vmatprep.subr.bf16.mxu1 %v1004_v7  ;;  %v1009_v11 = vld [vmem:[#allocation7 + $0x20] ss:$8 sps:$4 sm:$0xff]   ;;  %v1010_v12 = vld [vmem:[#allocation7 + $0x34] ss:$8 sps:$4 sm:$0xff]   ;;  %v1012_v14 = vld [vmem:[#allocation7 + $0x30] ss:$8 sps:$4 sm:$0xff]   ;;  %375 = vmatprep.mubr.bf16.mxu1 %v1235_v27 }
  0x72   :  { %v999_v15 = vld [vmem:[#allocation5 + $0x30] sm:$0xff]   ;;  %v1000_v16 = vld [vmem:[#allocation5 + $0x38] sm:$0xff]   ;;  %v1013_v19 = vld [vmem:[#allocation7 + $0x44] ss:$8 sps:$4 sm:$0xff]   ;;  %v255_v59 = vsub.s32 0, %v254_v58  ;;  %v259_v61 = vsub.s32 1, %v254_v58 }
  0x73   :  { %922 = vmatpush3.bf16.msra.mxu0 %v994_v2  ;;  %v120_v17 = vld [vmem:[#allocation2] sm:$0xff]  ;;  %v1015_v20 = vld [vmem:[#allocation7 + $0x40] ss:$8 sps:$4 sm:$0xff]   ;;  %v1019_v23 = vld [vmem:[#allocation7 + $0x64] ss:$8 sps:$4 sm:$0xff]   ;;  %s798_s21 = sshll.u32 %s1236_s19, 4  ;;  %s799_s21 = int_to_ptr.vmem [resolvable:$true] %s798_s21 }
  0x74   :  { %923 = vmatprep.subr.bf16.mxu0 %v1233_v0  ;;  %346 = vmatpush1.bf16.msra.mxu1 %v1006_v8  ;;  %v121_v18 = vpack.c.bf16 %v120_v17, %v120_v17  ;;  %v1016_v21 = vld [vmem:[#allocation7 + $0x54] ss:$8 sps:$4 sm:$0xff]   ;;  %v1018_v22 = vld [vmem:[#allocation7 + $0x50] ss:$8 sps:$4 sm:$0xff]   ;;  %v1021_v24 = vld [vmem:[#allocation7 + $0x60] ss:$8 sps:$4 sm:$0xff]   ;;  %p1196_p7 = scmp.lt.s32.totalorder %s799_s21, %s799_s21 }
  0x75   :  { %347 = vmatprep.subr.bf16.mxu1 %v1007_v10  ;;  %v1022_v25 = vld [vmem:[#allocation7 + $0x74] ss:$8 sps:$4 sm:$0xff]   ;;  %v1024_v26 = vld [vmem:[#allocation7 + $0x70] ss:$8 sps:$4 sm:$0xff]   ;;  %v1025_v28 = vld [vmem:[#allocation8 + $0x40] sm:$0xff]  }
  0x76   :  { %v1026_v29 = vld [vmem:[#allocation8] sm:$0xff]   ;;  %v1027_v30 = vld [vmem:[#allocation8 + $0x48] sm:$0xff]   ;;  %v1029_v32 = vld [vmem:[#allocation8 + $0x50] sm:$0xff]  }
  0x77   :  { %924 = vmatpush3.bf16.msra.mxu0 %v995_v3  ;;  %v1028_v31 = vld [vmem:[#allocation8 + $0x8] sm:$0xff]   ;;  %v1030_v33 = vld [vmem:[#allocation8 + $0x10] sm:$0xff]   ;;  %v1031_v34 = vld [vmem:[#allocation8 + $0x58] sm:$0xff]  }
  0x78   :  { %925 = vmatprep.subr.bf16.mxu0 %v1233_v0  ;;  %348 = vmatpush1.bf16.msra.mxu1 %v1009_v11  ;;  %v1032_v35 = vld [vmem:[#allocation8 + $0x18] sm:$0xff]   ;;  %v1033_v36 = vld [vmem:[#allocation8 + $0x60] sm:$0xff]   ;;  %v1035_v38 = vld [vmem:[#allocation8 + $0x68] sm:$0xff]  }
  0x79   :  { %349 = vmatprep.subr.bf16.mxu1 %v1010_v12  ;;  %v1034_v37 = vld [vmem:[#allocation8 + $0x20] sm:$0xff]   ;;  %v1036_v39 = vld [vmem:[#allocation8 + $0x28] sm:$0xff]   ;;  %v810_v40 = vld [vmem:[%s1447_s2] ss:$0 sm:$0xff] }
  0x7a   :  { %v1037_v48 = vld [vmem:[#allocation8 + $0x70] sm:$0xff]   ;;  %v1039_v50 = vld [vmem:[#allocation8 + $0x78] sm:$0xff]   ;;  %v1041_v52 = vld [vmem:[#allocation10] sm:$0xff]  }
  0x7b   :  { %926 = vmatpush3.bf16.msra.mxu0 %v996_v6  ;;  %v1038_v49 = vld [vmem:[#allocation8 + $0x30] sm:$0xff]   ;;  %v1040_v51 = vld [vmem:[#allocation8 + $0x38] sm:$0xff]   ;;  %v1042_v53 = vld [vmem:[#allocation10 + $0x8] sm:$0xff]  }
  0x7c   :  { %927 = vmatprep.subr.bf16.mxu0 %v1233_v0  ;;  %350 = vmatpush1.bf16.msra.mxu1 %v1012_v14  ;;  %v1043_v54 = vld [vmem:[#allocation10 + $0x10] sm:$0xff]   ;;  %v1044_v55 = vld [vmem:[#allocation10 + $0x18] sm:$0xff]   ;;  %v1045_v56 = vld [vmem:[#allocation10 + $0x20] sm:$0xff]  }
  0x7d   :  { %351 = vmatprep.subr.bf16.mxu1 %v1013_v19  ;;  %v251_v60 = vld [vmem:[%s1449_s4] sm:$0x3]  ;;  %v1046_v11 = vld [vmem:[#allocation10 + $0x28] sm:$0xff]   ;;  %v1047_v12 = vld [vmem:[#allocation10 + $0x30] sm:$0xff]  }
  0x7e   :  { %v256_v62 = vrot.slane %v251_v60, %v255_v59  ;;  %v260_v63 = vrot.slane %v251_v60, %v259_v61  ;;  %v1049_v14 = vld [vmem:[#allocation11] sm:$0xff]   ;;  %v1052_v17 = vld [vmem:[#allocation11 + $0x18] sm:$0xff]   ;;  %v1054_v19 = vld [vmem:[#allocation11 + $0x28] sm:$0xff]  }
  0x7f   :  { %928 = vmatpush3.bf16.msra.mxu0 %v997_v9 }
  0x80   :  { %929 = vmatprep.subr.bf16.mxu0 %v1233_v0  ;;  %352 = vmatpush1.bf16.msra.mxu1 %v1015_v20 }
  0x81   :  { %353 = vmatprep.subr.bf16.mxu1 %v1016_v21  ;;  %v835_v21 = vld [vmem:[%s1451_s6] ss:$0 sm:$0xff] }
  0x83   :  { %930 = vmatpush3.bf16.msra.mxu0 %v998_v13  ;;  %v1048_v13 = vld [vmem:[#allocation10 + $0x38] sm:$0xff]  }
  0x84   :  { %931 = vmatprep.subr.bf16.mxu0 %v1233_v0  ;;  %354 = vmatpush1.bf16.msra.mxu1 %v1018_v22 }
  0x85   :  { %355 = vmatprep.subr.bf16.mxu1 %v1019_v23 }
  0x87   :  { %932 = vmatpush3.bf16.msra.mxu0 %v999_v15  ;;  %v1050_v15 = vld [vmem:[#allocation11 + $0x8] sm:$0xff]  }
  0x88   :  { %933 = vmatprep.subr.bf16.mxu0 %v1233_v0  ;;  %356 = vmatpush1.bf16.msra.mxu1 %v1021_v24 }
  0x89   :  { %357 = vmatprep.subr.bf16.mxu1 %v1022_v25 }
  0x8b   :  { %934 = vmatpush3.bf16.msra.mxu0 %v1000_v16  ;;  %v1051_v16 = vld [vmem:[#allocation11 + $0x10] sm:$0xff]  }
  0x8c   :  { %358 = vmatpush1.bf16.msra.mxu1 %v1024_v26  ;;  %879 = vmatprep.subr.bf16.mxu0 %v1025_v28 }
  0x8d   :  { %939 = vmatprep.subr.bf16.mxu1 %v1233_v0 }
  0x8e   :  { %936 = vmatmul.mubr.bf16.vlgmr.msra.gmra.mrb[0].mxu0 %v121_v18  ;;  %v1053_v18 = vld [vmem:[#allocation11 + $0x20] sm:$0xff]  }
  0x8f   :  { %880 = vmatpush3.bf16.msra.mxu0 %v1026_v29 }
  0x90   :  { %881 = vmatprep.subr.bf16.mxu0 %v1027_v30  ;;  %v1055_v30 = vld [vmem:[#allocation11 + $0x30] sm:$0xff]  }
  0x93   :  { %882 = vmatpush3.bf16.msra.mxu0 %v1028_v31  ;;  %v1056_v31 = vld [vmem:[#allocation11 + $0x38] sm:$0xff]  }
  0x94   :  { %883 = vmatprep.subr.bf16.mxu0 %v1029_v32  ;;  %v852_v32 = vld [vmem:[%s1453_s8] ss:$0 sm:$0xff]  ;;  %s1191_s8 = scalar_lea.vmem %s799_s21, 128 }
  0x95   :  { %p1192_p6 = scmp.ne.s32.totalorder %s799_s21, %s1191_s8  ;;  %p1197_p8 = scmp.lt.s32.totalorder %s1191_s8, %s1191_s8 }
  0x97   :  { %884 = vmatpush3.bf16.msra.mxu0 %v1030_v33  ;;  %p1198_p9 = por %p1197_p8, %p1196_p7 }
  0x98   :  { %885 = vmatprep.subr.bf16.mxu0 %v1031_v34 }
  0x99   :  { %p1199_p10 = pnand %p1198_p9, %p1192_p6 }
  0x9b   :  { %886 = vmatpush3.bf16.msra.mxu0 %v1032_v35 }
  0x9c   :  { %887 = vmatprep.subr.bf16.mxu0 %v1033_v36 }
  0x9f   :  { %888 = vmatpush3.bf16.msra.mxu0 %v1034_v37 }
  0xa0   :  { %889 = vmatprep.subr.bf16.mxu0 %v1035_v38 }
  0xa3   :  { %890 = vmatpush3.bf16.msra.mxu0 %v1036_v39 }
  0xa4   :  { %891 = vmatprep.subr.bf16.mxu0 %v1037_v48 }
  0xa7   :  { %892 = vmatpush3.bf16.msra.mxu0 %v1038_v49 }
  0xa8   :  { %893 = vmatprep.subr.bf16.mxu0 %v1039_v50 }
  0xab   :  { %894 = vmatpush3.bf16.msra.mxu0 %v1040_v51 }
  0xac   :  { %959 = vmatprep.subr.bf16.mxu0 %v1233_v0 }
 0x161   :  { %v227_v41 = vpop.f32.mrb[0].mxu0 }
 0x162   :  { %v228_v42 = vadd.f32 %v810_v40, %v227_v41  ;;  %v937_v43 = vpop.f32.mrb[1].mxu0  ;;  %v861_v40 = vld [vmem:[%s1455_s10] ss:$0 sm:$0xff] }
 0x163   :  { %v230_v44 = vpop.f32.mrb[2].mxu0 }
 0x164   :  { %1057 = vtanh.f32 %v228_v42  ;;  %v938_v45 = vpop.f32.mrb[3].mxu0 }
 0x16e   :  { %v1058_v46 = vpop.eup %1057 }
 0x16f   :  { %v234_v47 = vpack.c.bf16 %v1058_v46, %v1058_v46 }
 0x171   :  { %376 = vmatmul.mubr.bf16.vlgmr.msra.gmra.mrb[0].mxu1 %v234_v47 }
 0x172   :  { %955 = vmatprep.mubr.msk.bf16.mxu1 %vm1234_vm0, %v1233_v0  ;;  %940 = vmatpush3.bf16.msra.mxu1 %v1041_v52 }
 0x173   :  { %941 = vmatprep.subr.bf16.mxu1 %v1233_v0 }
 0x176   :  { %942 = vmatpush3.bf16.msra.mxu1 %v1042_v53 }
 0x177   :  { %943 = vmatprep.subr.bf16.mxu1 %v1233_v0 }
 0x17a   :  { %944 = vmatpush3.bf16.msra.mxu1 %v1043_v54 }
 0x17b   :  { %945 = vmatprep.subr.bf16.mxu1 %v1233_v0 }
 0x17e   :  { %946 = vmatpush3.bf16.msra.mxu1 %v1044_v55 }
 0x17f   :  { %947 = vmatprep.subr.bf16.mxu1 %v1233_v0 }
 0x182   :  { %948 = vmatpush3.bf16.msra.mxu1 %v1045_v56 }
 0x183   :  { %949 = vmatprep.subr.bf16.mxu1 %v1233_v0 }
 0x186   :  { %950 = vmatpush3.bf16.msra.mxu1 %v1046_v11 }
 0x187   :  { %951 = vmatprep.subr.bf16.mxu1 %v1233_v0 }
 0x18a   :  { %952 = vmatpush3.bf16.msra.mxu1 %v1047_v12 }
 0x18b   :  { %953 = vmatprep.subr.bf16.mxu1 %v1233_v0 }
 0x18e   :  { %954 = vmatpush3.bf16.msra.mxu1 %v1048_v13 }
 0x244   :  { %v377_v1 = vpop.f32.mrb[0].mxu1 }
 0x245   :  { %v378_v2 = vadd.f32 %v377_v1, %v256_v62  ;;  %v379_v3 = vpop.f32.mrb[1].mxu1 }
 0x246   :  { %v380_v4 = vadd.f32 %v379_v3, %v260_v63  ;;  %v381_v5 = vpop.f32.mrb[2].mxu1 }
 0x247   :  { %v384_v6 = vmax.f32 %v378_v2, 0.0  ;;  %v382_v7 = vpop.f32.mrb[3].mxu1 }
 0x248   :  { %v385_v8 = vmax.f32 %v380_v4, 0.0 }
 0x249   :  { %v386_v10 = vpack.c.bf16 %v384_v6, %v384_v6 }
 0x24a   :  { %v387_v9 = vpack.c.bf16 %v385_v8, %v385_v8 }
 0x24c   :  { %555 = vmatprep.mubr.bf16.mxu0 %v387_v9 }
 0x24d   :  { %556 = vmatmul.mubr.bf16.vlgmr.msra.gmra.mrb[4].mxu0 %v386_v10 }
 0x24e   :  { %975 = vmatprep.mubr.msk.bf16.mxu0 %vm1234_vm0, %v1233_v0  ;;  %960 = vmatpush3.bf16.msra.mxu0 %v1049_v14 }
 0x24f   :  { %961 = vmatprep.subr.bf16.mxu0 %v1233_v0 }
 0x252   :  { %962 = vmatpush3.bf16.msra.mxu0 %v1050_v15 }
 0x253   :  { %963 = vmatprep.subr.bf16.mxu0 %v1233_v0 }
 0x256   :  { %964 = vmatpush3.bf16.msra.mxu0 %v1051_v16 }
 0x257   :  { %965 = vmatprep.subr.bf16.mxu0 %v1233_v0 }
 0x25a   :  { %966 = vmatpush3.bf16.msra.mxu0 %v1052_v17 }
 0x25b   :  { %967 = vmatprep.subr.bf16.mxu0 %v1233_v0 }
 0x25e   :  { %968 = vmatpush3.bf16.msra.mxu0 %v1053_v18 }
 0x25f   :  { %969 = vmatprep.subr.bf16.mxu0 %v1233_v0 }
 0x262   :  { %970 = vmatpush3.bf16.msra.mxu0 %v1054_v19 }
 0x263   :  { %971 = vmatprep.subr.bf16.mxu0 %v1233_v0 }
 0x266   :  { %972 = vmatpush3.bf16.msra.mxu0 %v1055_v30 }
 0x267   :  { %973 = vmatprep.subr.bf16.mxu0 %v1233_v0 }
 0x26a   :  { %974 = vmatpush3.bf16.msra.mxu0 %v1056_v31 }
 0x320   :  { %v895_v20 = vpop.f32.mrb[4].mxu0 }
 0x321   :  { %v896_v22 = vpop.f32.mrb[5].mxu0 }
 0x322   :  { %v897_v23 = vadd.f32 %v896_v22, %v895_v20  ;;  %v898_v24 = vpop.f32.mrb[6].mxu0 }
 0x323   :  { %v899_v25 = vpop.f32.mrb[7].mxu0 }
 0x324   :  { %v558_v26 = vadd.f32 %v897_v23, %v835_v21 }
 0x326   :  { %vm563_vm1 = vcmp.gt.f32.partialorder %v558_v26, 0.0  ;;  %v564_v27 = vmul.f32 0.01, %v558_v26 }
 0x328   :  { %v565_v28 = vsel %vm563_vm1, %v558_v26, %v564_v27 }
 0x329   :  { %v566_v29 = vpack.c.bf16 %v565_v28, %v565_v28 }
 0x32b   :  { %956 = vmatmul.mubr.bf16.vlgmr.msra.gmra.mrb[4].mxu1 %v566_v29 }
 0x3fe   :  { %v672_v33 = vpop.f32.mrb[4].mxu1 }
 0x3ff   :  { %v673_v34 = vadd.f32 %v852_v32, %v672_v33  ;;  %v957_v35 = vpop.f32.mrb[5].mxu1 }
 0x400   :  { %v675_v36 = vpop.f32.mrb[6].mxu1 }
 0x401   :  { %v678_v37 = vmax.f32 %v673_v34, 0.0  ;;  %v958_v38 = vpop.f32.mrb[7].mxu1 }
 0x403   :  { %v679_v39 = vpack.c.bf16 %v678_v37, %v678_v37 }
 0x405   :  { %976 = vmatmul.mubr.bf16.vlgmr.msra.gmra.mrb[8].mxu0 %v679_v39 }
 0x4d8   :  { %v785_v0 = vpop.f32.mrb[8].mxu0 }
 0x4d9   :  { %v786_v41 = vadd.f32 %v861_v40, %v785_v0  ;;  %v977_v42 = vpop.f32.mrb[9].mxu0 }
 0x4da   :  { %v788_v43 = vpop.f32.mrb[10].mxu0 }
 0x4db   :  { %791 = vst [vmem:[#allocation13] sm:$0xff] %v786_v41  ;;  %v978_v44 = vpop.f32.mrb[11].mxu0 }
 0x4dc   :  { %1202 = shalt.err (!%p1199_p10)
}
 0x4dd   :  { %s1203_s10 = scalar_lea.hbm %s1456_s11, 128 }
 0x4de   :  { %p1204_p11 = scmp.ne.s32.totalorder %s1456_s11, %s1203_s10  ;;  %p1207_p12 = scmp.lt.u32.totalorder %s1203_s10, %s1456_s11 }
 0x4e0   :  { %p1209_p13 = pnand %p1207_p12, %p1204_p11 }
 0x4e2   :  { %1212 = shalt.err (!%p1209_p13)
}
 0x4e3   :  { %801 = dma.vmem_to_hbm [thread:$0]  %s799_s21, 128, %s1456_s11, [#allocation4]  }
 0x4e4   :  { %1221 = dma.done.wait [#allocation4], 128  }
 0x4e5   :  { %1222 = vsyncadd [#allocation4], 4294967168 }
 0x4e6   :  { %805 = vsyncpa [#allocation3], 1 }
 0x4e7   :  { %806 = vsyncpa [#allocation6], 1 }
 0x4e8   :  { %807 = vsyncpa [#allocation9], 1 }
 0x4e9   :  { %808 = vsyncpa [#allocation12], 1 }
 0x4ea   :  { %809 = vsyncpa [#allocation4], 1 }

</bundles_post_ra>
